<compile_context>
chip_gen: v5e
topology: v5e:2x2
jax: 0.10.0
libtpu: 0.0.40
codegen_flags: <defaults>
</compile_context>

<pallas_src>
import functools
import math

import jax
import jax.numpy as jnp
from jax.experimental import pallas as pl
from jax.experimental.pallas import tpu as pltpu


def _round_up(x: int, m: int) -> int:
    return ((x + m - 1) // m) * m


@functools.lru_cache(maxsize=None)
def _single_buffer_supported() -> bool:
    """Probe whether pipeline_mode=pl.Buffered(1) lowers on this jax/backend."""
    if not hasattr(pl, "Buffered"):
        return False
    try:
        def k(x_ref, w_ref, o_ref):
            o_ref[...] = x_ref[...] + w_ref[...]

        fn = pl.pallas_call(
            k,
            out_shape=jax.ShapeDtypeStruct((16, 128), jnp.float32),
            grid=(2,),
            in_specs=[
                pl.BlockSpec((8, 128), lambda i: (i, 0)),
                pl.BlockSpec((8, 128), lambda i: (0, 0),
                             pipeline_mode=pl.Buffered(1)),
            ],
            out_specs=pl.BlockSpec((8, 128), lambda i: (i, 0)),
        )
        jax.block_until_ready(
            fn(jnp.zeros((16, 128), jnp.float32),
               jnp.zeros((8, 128), jnp.float32)))
        return True
    except Exception:
        return False


@functools.lru_cache(maxsize=None)
def _vmem_limit_bytes() -> int:
    """Scoped-VMEM limit: ~32 MiB on v7x (64 MiB phys), ~96 MiB on v5e/v6e."""
    limit = 32 * 1024 * 1024
    try:
        info = pltpu.get_tpu_info()
        cap = int(getattr(info, "vmem_capacity_bytes", 0) or 0)
        if cap >= 100 * 1024 * 1024:          # v5e / v6e: 128 MiB physical
            limit = 96 * 1024 * 1024
    except Exception:
        pass
    return limit


def _resident_spec(shape):
    """BlockSpec for a grid-invariant (VMEM-resident) operand."""
    if _single_buffer_supported():
        return pl.BlockSpec(shape, lambda i: (0, 0),
                            pipeline_mode=pl.Buffered(1))
    return pl.BlockSpec(shape, lambda i: (0, 0))


def _fused_mlp_kernel(x_ref, *refs, num_layers: int, compute_dtype):
    """Run one batch tile through the whole MLP (all dims 128-lane padded).

      x_ref : [TB, D0]       compute_dtype activation tile
      refs  : (w_0..w_{L-1}  [D_i, D_{i+1}] compute_dtype, VMEM-resident
               b_0..b_{L-1}  [1,  D_{i+1}]  f32,           VMEM-resident
               o_ref)        [TB, D_L]      f32 output tile
    """
    w_refs = refs[:num_layers]
    b_refs = refs[num_layers:2 * num_layers]
    o_ref = refs[2 * num_layers]

    h = x_ref[...]
    for i in range(num_layers):
        acc = jnp.dot(h, w_refs[i][...], preferred_element_type=jnp.float32)
        acc = acc + b_refs[i][...]                   # f32 bias, row broadcast
        if i < num_layers - 1:
            h = jnp.maximum(acc, 0.0).astype(compute_dtype)   # ReLU on VPU
        else:
            o_ref[...] = acc.astype(o_ref.dtype)


def make_mlp_forward(params, *, tile_batch: int = 256,
                     compute_dtype=jnp.float32):
    """Build a cached, jitted forward pass for the given MLP parameters.

    params: list of (w [in, out], b [out]) float32 (w already transposed
            w.r.t. PyTorch nn.Linear's [out, in] layout).
    Returns fn(x: [..., input_dim]) -> [..., output_dim] float32.
    """
    num_layers = len(params)
    in_dim = params[0][0].shape[0]
    out_dim = params[-1][0].shape[1]
    dims = [in_dim] + [w.shape[1] for w, _ in params]
    pdims = [_round_up(d, 128) for d in dims]        # lane-dense feature dims
    cdt_bytes = jnp.dtype(compute_dtype).itemsize

    # ---- Pre-pad weights/biases ONCE (hoisted out of the per-call path). ----
    w_pad, b_pad = [], []
    for i, (w, b) in enumerate(params):
        wp = jnp.pad(jnp.asarray(w, compute_dtype),
                     ((0, pdims[i] - w.shape[0]),
                      (0, pdims[i + 1] - w.shape[1])))
        bp = jnp.pad(jnp.asarray(b, jnp.float32).reshape(1, -1),
                     ((0, 0), (0, pdims[i + 1] - b.shape[0])))
        w_pad.append(wp)
        b_pad.append(bp)

    weight_buffers = 1 if _single_buffer_supported() else 2
    resident_bytes = weight_buffers * (
        sum(pdims[i] * pdims[i + 1] for i in range(num_layers)) * cdt_bytes
        + sum(8 * pdims[i + 1] for i in range(num_layers)) * 4)
    vmem_limit = _vmem_limit_bytes()
    vmem_budget = int(0.75 * vmem_limit)

    @jax.jit
    def _forward(x, *wb):
        ws, bs = wb[:num_layers], wb[num_layers:]
        orig_shape = x.shape
        x2 = x.reshape(-1, in_dim)
        B = x2.shape[0]

        # Batch tile: multiple of 16 (bf16 sublane packing); split into >= 2
        # tiles when possible so ("parallel",) can use both v7x TensorCores.
        TB = min(tile_batch, max(16, _round_up(-(-B // 2), 16)))
        TB = max(16, _round_up(TB, 16))

        # VMEM guard: resident weights + double-buffered activation tiles
        # must fit the scoped budget (matters on v7x's 64 MiB physical VMEM).
        def _act_bytes(tb):
            return 2 * tb * (pdims[0] * cdt_bytes + pdims[-1] * 4)
        while TB > 16 and resident_bytes + _act_bytes(TB) > vmem_budget:
            TB = max(16, _round_up(TB // 2, 16))
        # TODO(synk): if resident_bytes alone exceeds the budget (hidden dims
        # of several thousand on v7x), stream weights per layer with
        # pltpu.emit_pipeline instead of keeping every layer VMEM-resident.

        Bp = _round_up(B, TB)
        grid = (Bp // TB,)

        # Zero-pad input rows/lanes (pads contribute nothing to the matmuls).
        xp = jnp.pad(x2.astype(compute_dtype),
                     ((0, Bp - B), (0, pdims[0] - in_dim)))

        in_specs = [pl.BlockSpec((TB, pdims[0]), lambda i: (i, 0))]
        for li in range(num_layers):
            in_specs.append(_resident_spec((pdims[li], pdims[li + 1])))
        for li in range(num_layers):
            in_specs.append(_resident_spec((1, pdims[li + 1])))
        out_spec = pl.BlockSpec((TB, pdims[-1]), lambda i: (i, 0))

        kernel = functools.partial(_fused_mlp_kernel,
                                   num_layers=num_layers,
                                   compute_dtype=compute_dtype)

        out_padded = pl.pallas_call(
            kernel,
            out_shape=jax.ShapeDtypeStruct((Bp, pdims[-1]), jnp.float32),
            grid=grid,
            in_specs=in_specs,
            out_specs=out_spec,
            compiler_params=pltpu.CompilerParams(
                dimension_semantics=("parallel",),   # shard batch tiles (v7x)
                vmem_limit_bytes=vmem_limit,
            ),
        )(xp, *ws, *bs)

        # Slice + reshape fused under the same jit (no extra HBM round trip).
        return out_padded[:B, :out_dim].reshape(*orig_shape[:-1], out_dim)

    def forward(x):
        return _forward(x, *w_pad, *b_pad)

    return forward


def init_mlp_params(key, input_dim, output_dim, hidden_dims, bias=True):
    """Deterministic init mirroring nn.Linear's default U(-1/sqrt(fan_in), +)."""
    dims = [input_dim] + list(hidden_dims) + [output_dim]
    params = []
    for i in range(len(dims) - 1):
        fan_in, fan_out = dims[i], dims[i + 1]
        key, kw, kb = jax.random.split(key, 3)
        bound = 1.0 / math.sqrt(fan_in)
        w = jax.random.uniform(
            kw, (fan_in, fan_out), jnp.float32, minval=-bound, maxval=bound)
        if bias:
            b = jax.random.uniform(
                kb, (fan_out,), jnp.float32, minval=-bound, maxval=bound)
        else:
            b = jnp.zeros((fan_out,), jnp.float32)
        params.append((w, b))
    return params


if __name__ == "__main__":
    # Shapes consistent with the module: batch=8, input_dim=32, output_dim=16,
    # hidden_dims default [100, 100, 100].
    batch, input_dim, output_dim = 8, 32, 16
    hidden_dims = [100, 100, 100]

    key = jax.random.PRNGKey(0)
    key, kx = jax.random.split(key)
    x = jax.random.normal(kx, (batch, input_dim), jnp.float32)

    params = init_mlp_params(key, input_dim, output_dim, hidden_dims, bias=True)

    forward = make_mlp_forward(params)          # pads + jits once
    out = jax.block_until_ready(forward(x))     # compile + run
    out = jax.block_until_ready(forward(x))     # cached steady-state path

    # Plain-JAX f32 reference (same semantics as the PyTorch module), computed
    # at HIGHEST precision so the comparison is against true f32 numerics.
    ref = x
    for i, (w, b) in enumerate(params):
        ref = jnp.dot(ref, w, precision=jax.lax.Precision.HIGHEST) + b.reshape(1, -1)
        if i < len(params) - 1:
            ref = jnp.maximum(ref, 0.0)

    assert out.shape == (batch, output_dim)
    err = float(jnp.max(jnp.abs(out - ref)))
    assert jnp.allclose(out, ref, atol=2e-3, rtol=2e-3), err

    print("KERNEL_OK")
</pallas_src>

<mosaic_0001>
module attributes {stable_mosaic.version = 11 : i64} {
  func.func @k(%arg0: i32, %arg1: memref<8x128xf32, #tpu.memory_space<vmem>>, %arg2: memref<8x128xf32, #tpu.memory_space<vmem>>, %arg3: memref<8x128xf32, #tpu.memory_space<vmem>>) attributes {dimension_semantics = [#tpu.dimension_semantics<arbitrary>], iteration_bounds = array<i64: 2>, scalar_prefetch = 0 : i64, scratch_operands = 0 : i64, tpu.core_type = #tpu.core_type<tc>, window_params = [{transform_indices = @transform_0, window_bounds = array<i64: 8, 128>}, {pipeline_mode = #tpu.pipeline_mode<synchronous>, transform_indices = @transform_1, window_bounds = array<i64: 8, 128>}, {transform_indices = @transform_2, window_bounds = array<i64: 8, 128>}]} {
    %c0 = arith.constant 0 : index
    %c0_0 = arith.constant 0 : index
    %0 = vector.load %arg1[%c0, %c0_0] : memref<8x128xf32, #tpu.memory_space<vmem>>, vector<8x128xf32>
    %c0_1 = arith.constant 0 : index
    %c0_2 = arith.constant 0 : index
    %1 = vector.load %arg2[%c0_1, %c0_2] : memref<8x128xf32, #tpu.memory_space<vmem>>, vector<8x128xf32>
    %2 = arith.addf %0, %1 : vector<8x128xf32>
    %c0_3 = arith.constant 0 : index
    %c0_4 = arith.constant 0 : index
    %3 = vector.load %arg3[%c0_3, %c0_4] : memref<8x128xf32, #tpu.memory_space<vmem>>, vector<8x128xf32>
    tpu.vector_store %arg3[%c0_3, %c0_4], %2 {strides = array<i32>} : memref<8x128xf32, #tpu.memory_space<vmem>>, vector<8x128xf32>,
    return
  }
  func.func @transform_0(%arg0: i32) -> (i32, i32) {
    %c0_i32 = arith.constant 0 : i32
    %c0_i32_0 = arith.constant 0 : i32
    return %arg0, %c0_i32 : i32, i32
  }
  func.func @transform_1(%arg0: i32) -> (i32, i32) {
    %c0_i32 = arith.constant 0 : i32
    %c0_i32_0 = arith.constant 0 : i32
    %c0_i32_1 = arith.constant 0 : i32
    return %c0_i32, %c0_i32_0 : i32, i32
  }
  func.func @transform_2(%arg0: i32) -> (i32, i32) {
    %c0_i32 = arith.constant 0 : i32
    %c0_i32_0 = arith.constant 0 : i32
    return %arg0, %c0_i32 : i32, i32
  }
}

module attributes {stable_mosaic.version = 11 : i64} {
  func.func @_fused_mlp_kernel(%arg0: i32, %arg1: memref<16x128xf32, #tpu.memory_space<vmem>>, %arg2: memref<128x128xf32, #tpu.memory_space<vmem>>, %arg3: memref<128x128xf32, #tpu.memory_space<vmem>>, %arg4: memref<128x128xf32, #tpu.memory_space<vmem>>, %arg5: memref<128x128xf32, #tpu.memory_space<vmem>>, %arg6: memref<1x128xf32, #tpu.memory_space<vmem>>, %arg7: memref<1x128xf32, #tpu.memory_space<vmem>>, %arg8: memref<1x128xf32, #tpu.memory_space<vmem>>, %arg9: memref<1x128xf32, #tpu.memory_space<vmem>>, %arg10: memref<16x128xf32, #tpu.memory_space<vmem>>) attributes {dimension_semantics = [#tpu.dimension_semantics<parallel>], iteration_bounds = array<i64: 1>, scalar_prefetch = 0 : i64, scratch_operands = 0 : i64, tpu.core_type = #tpu.core_type<tc>, window_params = [{transform_indices = @transform_0, window_bounds = array<i64: 16, 128>}, {pipeline_mode = #tpu.pipeline_mode<synchronous>, transform_indices = @transform_1, window_bounds = array<i64: 128, 128>}, {pipeline_mode = #tpu.pipeline_mode<synchronous>, transform_indices = @transform_2, window_bounds = array<i64: 128, 128>}, {pipeline_mode = #tpu.pipeline_mode<synchronous>, transform_indices = @transform_3, window_bounds = array<i64: 128, 128>}, {pipeline_mode = #tpu.pipeline_mode<synchronous>, transform_indices = @transform_4, window_bounds = array<i64: 128, 128>}, {pipeline_mode = #tpu.pipeline_mode<synchronous>, transform_indices = @transform_5, window_bounds = array<i64: 1, 128>}, {pipeline_mode = #tpu.pipeline_mode<synchronous>, transform_indices = @transform_6, window_bounds = array<i64: 1, 128>}, {pipeline_mode = #tpu.pipeline_mode<synchronous>, transform_indices = @transform_7, window_bounds = array<i64: 1, 128>}, {pipeline_mode = #tpu.pipeline_mode<synchronous>, transform_indices = @transform_8, window_bounds = array<i64: 1, 128>}, {transform_indices = @transform_9, window_bounds = array<i64: 16, 128>}]} {
    %c0 = arith.constant 0 : index
    %c0_0 = arith.constant 0 : index
    %0 = vector.load %arg1[%c0, %c0_0] : memref<16x128xf32, #tpu.memory_space<vmem>>, vector<16x128xf32>
    %c0_1 = arith.constant 0 : index
    %c0_2 = arith.constant 0 : index
    %1 = vector.load %arg2[%c0_1, %c0_2] : memref<128x128xf32, #tpu.memory_space<vmem>>, vector<128x128xf32>
    %cst = arith.constant dense<0.000000e+00> : vector<16x128xf32>
    %2 = tpu.matmul %0, %1, %cst {dimension_numbers = #tpu.dot_dimension_numbers<[1], [0], [0], [1], [0, 0, 1, 1], [], []>} : vector<16x128xf32>, vector<128x128xf32>, vector<16x128xf32> -> vector<16x128xf32>
    %c0_3 = arith.constant 0 : index
    %c0_4 = arith.constant 0 : index
    %3 = vector.load %arg6[%c0_3, %c0_4] : memref<1x128xf32, #tpu.memory_space<vmem>>, vector<1x128xf32>
    %4 = vector.broadcast %3 : vector<1x128xf32> to vector<16x128xf32>
    %5 = arith.addf %2, %4 : vector<16x128xf32>
    %cst_5 = arith.constant 0.000000e+00 : f32
    %6 = vector.broadcast %cst_5 : f32 to vector<16x128xf32>
    %7 = arith.maximumf %5, %6 : vector<16x128xf32>
    %c0_6 = arith.constant 0 : index
    %c0_7 = arith.constant 0 : index
    %8 = vector.load %arg3[%c0_6, %c0_7] : memref<128x128xf32, #tpu.memory_space<vmem>>, vector<128x128xf32>
    %cst_8 = arith.constant dense<0.000000e+00> : vector<16x128xf32>
    %9 = tpu.matmul %7, %8, %cst_8 {dimension_numbers = #tpu.dot_dimension_numbers<[1], [0], [0], [1], [0, 0, 1, 1], [], []>} : vector<16x128xf32>, vector<128x128xf32>, vector<16x128xf32> -> vector<16x128xf32>
    %c0_9 = arith.constant 0 : index
    %c0_10 = arith.constant 0 : index
    %10 = vector.load %arg7[%c0_9, %c0_10] : memref<1x128xf32, #tpu.memory_space<vmem>>, vector<1x128xf32>
    %11 = vector.broadcast %10 : vector<1x128xf32> to vector<16x128xf32>
    %12 = arith.addf %9, %11 : vector<16x128xf32>
    %cst_11 = arith.constant 0.000000e+00 : f32
    %13 = vector.broadcast %cst_11 : f32 to vector<16x128xf32>
    %14 = arith.maximumf %12, %13 : vector<16x128xf32>
    %c0_12 = arith.constant 0 : index
    %c0_13 = arith.constant 0 : index
    %15 = vector.load %arg4[%c0_12, %c0_13] : memref<128x128xf32, #tpu.memory_space<vmem>>, vector<128x128xf32>
    %cst_14 = arith.constant dense<0.000000e+00> : vector<16x128xf32>
    %16 = tpu.matmul %14, %15, %cst_14 {dimension_numbers = #tpu.dot_dimension_numbers<[1], [0], [0], [1], [0, 0, 1, 1], [], []>} : vector<16x128xf32>, vector<128x128xf32>, vector<16x128xf32> -> vector<16x128xf32>
    %c0_15 = arith.constant 0 : index
    %c0_16 = arith.constant 0 : index
    %17 = vector.load %arg8[%c0_15, %c0_16] : memref<1x128xf32, #tpu.memory_space<vmem>>, vector<1x128xf32>
    %18 = vector.broadcast %17 : vector<1x128xf32> to vector<16x128xf32>
    %19 = arith.addf %16, %18 : vector<16x128xf32>
    %cst_17 = arith.constant 0.000000e+00 : f32
    %20 = vector.broadcast %cst_17 : f32 to vector<16x128xf32>
    %21 = arith.maximumf %19, %20 : vector<16x128xf32>
    %c0_18 = arith.constant 0 : index
    %c0_19 = arith.constant 0 : index
    %22 = vector.load %arg5[%c0_18, %c0_19] : memref<128x128xf32, #tpu.memory_space<vmem>>, vector<128x128xf32>
    %cst_20 = arith.constant dense<0.000000e+00> : vector<16x128xf32>
    %23 = tpu.matmul %21, %22, %cst_20 {dimension_numbers = #tpu.dot_dimension_numbers<[1], [0], [0], [1], [0, 0, 1, 1], [], []>} : vector<16x128xf32>, vector<128x128xf32>, vector<16x128xf32> -> vector<16x128xf32>
    %c0_21 = arith.constant 0 : index
    %c0_22 = arith.constant 0 : index
    %24 = vector.load %arg9[%c0_21, %c0_22] : memref<1x128xf32, #tpu.memory_space<vmem>>, vector<1x128xf32>
    %25 = vector.broadcast %24 : vector<1x128xf32> to vector<16x128xf32>
    %26 = arith.addf %23, %25 : vector<16x128xf32>
    %c0_23 = arith.constant 0 : index
    %c0_24 = arith.constant 0 : index
    %27 = vector.load %arg10[%c0_23, %c0_24] : memref<16x128xf32, #tpu.memory_space<vmem>>, vector<16x128xf32>
    tpu.vector_store %arg10[%c0_23, %c0_24], %26 {strides = array<i32>} : memref<16x128xf32, #tpu.memory_space<vmem>>, vector<16x128xf32>,
    return
  }
  func.func @transform_0(%arg0: i32) -> (i32, i32) {
    %c0_i32 = arith.constant 0 : i32
    %c0_i32_0 = arith.constant 0 : i32
    return %arg0, %c0_i32 : i32, i32
  }
  func.func @transform_1(%arg0: i32) -> (i32, i32) {
    %c0_i32 = arith.constant 0 : i32
    %c0_i32_0 = arith.constant 0 : i32
    %c0_i32_1 = arith.constant 0 : i32
    return %c0_i32, %c0_i32_0 : i32, i32
  }
  func.func @transform_2(%arg0: i32) -> (i32, i32) {
    %c0_i32 = arith.constant 0 : i32
    %c0_i32_0 = arith.constant 0 : i32
    %c0_i32_1 = arith.constant 0 : i32
    return %c0_i32, %c0_i32_0 : i32, i32
  }
  func.func @transform_3(%arg0: i32) -> (i32, i32) {
    %c0_i32 = arith.constant 0 : i32
    %c0_i32_0 = arith.constant 0 : i32
    %c0_i32_1 = arith.constant 0 : i32
    return %c0_i32, %c0_i32_0 : i32, i32
  }
  func.func @transform_4(%arg0: i32) -> (i32, i32) {
    %c0_i32 = arith.constant 0 : i32
    %c0_i32_0 = arith.constant 0 : i32
    %c0_i32_1 = arith.constant 0 : i32
    return %c0_i32, %c0_i32_0 : i32, i32
  }
  func.func @transform_5(%arg0: i32) -> (i32, i32) {
    %c0_i32 = arith.constant 0 : i32
    %c0_i32_0 = arith.constant 0 : i32
    %c0_i32_1 = arith.constant 0 : i32
    return %c0_i32, %c0_i32_0 : i32, i32
  }
  func.func @transform_6(%arg0: i32) -> (i32, i32) {
    %c0_i32 = arith.constant 0 : i32
    %c0_i32_0 = arith.constant 0 : i32
    %c0_i32_1 = arith.constant 0 : i32
    return %c0_i32, %c0_i32_0 : i32, i32
  }
  func.func @transform_7(%arg0: i32) -> (i32, i32) {
    %c0_i32 = arith.constant 0 : i32
    %c0_i32_0 = arith.constant 0 : i32
    %c0_i32_1 = arith.constant 0 : i32
    return %c0_i32, %c0_i32_0 : i32, i32
  }
  func.func @transform_8(%arg0: i32) -> (i32, i32) {
    %c0_i32 = arith.constant 0 : i32
    %c0_i32_0 = arith.constant 0 : i32
    %c0_i32_1 = arith.constant 0 : i32
    return %c0_i32, %c0_i32_0 : i32, i32
  }
  func.func @transform_9(%arg0: i32) -> (i32, i32) {
    %c0_i32 = arith.constant 0 : i32
    %c0_i32_0 = arith.constant 0 : i32
    return %arg0, %c0_i32 : i32, i32
  }
}

</mosaic_0001>

<bundles_post_ra>
// kernel: tpu_custom_call.1
= control target key start
LH: loop header
LB: loop body
LE: loop exit
PB: predicated region body
PF: predicated region fallthrough
CT: control target
= control target key end

     0   :  { %7 = vsyncpa [#allocation3], 0  ;;  %s633_s0 = inlined_call_operand.hbm [shape: f32[16,128], index: 0, kind: input, shape index: {}]   ;;  %s634_s1 = inlined_call_operand.hbm [shape: f32[8,128], index: 1, kind: input, shape index: {}]   ;;  %s635_s2 = inlined_call_operand.hbm [shape: f32[16,128], index: 2, kind: output, shape index: {}]  }
   0x1   :  { %9 = vsyncpa [#allocation3 + $0x1], 0 }
   0x2   :  { %10 = vsyncpa [#allocation6], 0 }
   0x3   :  { %11 = vsyncpa [#allocation4], 0 }
   0x4   :  { %13 = vsyncpa [#allocation4 + $0x1], 0  ;;  %s495_s9 = smov 0   ;;  %s497_s10 = smov 0  }
   0x5   :  { %s499_s11 = smov 0   ;;  %s501_s12 = smov 0  }
   0x6 LB: > { %s516_s13 = sadd.s32 4294967295, %s477_s12   ;;  %s276_s14 = sadd.s32 4294967294, %s477_s12   ;;  %s477_s12 = sphi %s501_s12, %s645_s12   ;;  %s473_s11 = sphi %s499_s11, %s644_s11   ;;  %s469_s10 = sphi %s497_s10, %s643_s10   ;;  %s465_s9 = sphi %s495_s9, %s642_s9  }
   0x7   : > { %p39_p0 = scmp.ne.s32.totalorder %s469_s10, %s465_s9  ;;  %p40_p1 = scmp.eq.s32.totalorder %s516_s13, 0 }
   0x8   : > { %p84_p2 = scmp.eq.s32.totalorder %s516_s13, 1  ;;  %p90_p3 = scmp.eq.s32.totalorder %s276_s14, 1 }
   0x9   : > { %p525_p4 = por %p40_p1, %p39_p0  ;;  %p277_p5 = scmp.ge.s32.totalorder %s477_s12, 1 }
   0xa   : > { %p530_p6 = por %p90_p3, %p39_p0  ;;  %p97_p7 = scmp.lt.s32.totalorder %s477_s12, 3 }
   0xb   : > { %s109_s19 = sshll.u32 %s634_s1, 4  ;;  %s479_s21 = smov [#allocation5]   ;;  %s110_s19 = int_to_ptr.hbm [resolvable:$true] %s109_s19 }
   0xc   : > { %p538_p8 = pnand %p277_p5, %p97_p7  ;;  %s111_s22 = sshll.u32 %s479_s21, 4  ;;  %s112_s22 = int_to_ptr.vmem [resolvable:$true] %s111_s22 }
   0xd   : > { %s548_s23 = sadd.s32 1, %s477_s12   ;;  %s26_s24 = sadd.s32 1, %s473_s11 }
   0xe   : > { %p298_p10 = pneg %p538_p8  ;;  %s23_s25 = ssub.s32 %s477_s12, %s548_s23 }
   0xf   : > { %p24_p12 = scmp.eq.s32.totalorder %s23_s25, 0  ;;  %p33_p13 = scmp.ne.s32.totalorder %s473_s11, %s469_s10 }
  0x10   : > { %p299_p11 = pnand %p298_p10, %p40_p1  ;;  %p34_p0 = scmp.eq.s32.totalorder %s477_s12, 0 }
  0x11   : > { %s557_s26 = scalar_select %p24_p12, %s473_s11, %s26_s24  }
  0x12   : > { %301 = dma.hbm_to_vmem [thread:$0]  (!%p299_p11), %s110_s19, 128, %s112_s22, [#allocation6]  }
  0x13   : > { %p561_p3 = por %p84_p2, %p33_p13  ;;  %p311_p5 = scmp.lt.s32.totalorder %s477_s12, 2 }
  0x14   : > { %s122_s28 = sand.u32 1, %s473_s11   ;;  %s281_s29 = sshll.u32 %s477_s12, 3 }
  0x15   : > { %p35_p7 = por %p34_p0, %p33_p13  ;;  %s280_s30 = sshll.u32 %s122_s28, 3 }
  0x16   : > { %s130_s5 = scalar_lea.hbm %s633_s0, %s281_s29  ;;  %s126_s7 = scalar_lea.vmem [#allocation2], %s280_s30 }
  0x17   : > { %s132_s6 = sshll.u32 %s130_s5, 4  ;;  %s134_s8 = sshll.u32 %s126_s7, 4  ;;  %s133_s6 = int_to_ptr.hbm [resolvable:$true] %s132_s6  ;;  %s135_s8 = int_to_ptr.vmem [resolvable:$true] %s134_s8 }
  0x18   : > { %p571_p10 = pnand %p311_p5, %p35_p7  ;;  %s123_s17 = scalar_lea.sflag [#allocation3], %s122_s28 }
  0x19   : > { %s377_s18 = sshra.s32 %s133_s6, 4  ;;  %s384_s24 = scalar_lea.hbm %s633_s0, 16  ;;  %s378_s18 = int_to_ptr.hbm [resolvable:$true] %s377_s18 }
  0x1a   : > { %s379_s19 = scalar_lea.hbm %s378_s18, 8  ;;  %p381_p11 = pneg %p571_p10 }
  0x1b   : > { %p380_p2 = scmp.ne.s32.totalorder %s378_s18, %s379_s19  ;;  %p385_p0 = scmp.lt.s32.totalorder %s378_s18, %s633_s0 }
  0x1c   : > { %p386_p5 = scmp.lt.s32.totalorder %s384_s24, %s379_s19 }
  0x1d   : > { %p382_p12 = pnand %p381_p11, %p380_p2 }
  0x1e   : > { %p387_p7 = por %p386_p5, %p385_p0 }
  0x1f   : > { %p383_p13 = pneg %p382_p12 }
  0x21   : > { %p388_p9 = pnand %p387_p7, %p383_p13 }
  0x23   : > { %391 = shalt.err (!%p388_p9)
}
  0x24   : > { %305 = dma.hbm_to_vmem [thread:$0]  (!%p571_p10), %s133_s6, 128, %s135_s8, %s123_s17  }
  0x25   : > { %143 = sbr.rel (%p538_p8) target bundleno = 60 (0x3c), region = 28  ;;  %s588_s28 = sand.u32 (!%p538_p8), 1, %s469_s10  }
  0x26   : > { %s283_s30 = sshll.u32 (!%p538_p8), %s588_s28, 3  ;;  %s146_s3 = scalar_lea.sflag (!%p538_p8), [#allocation3], %s588_s28 }
  0x27   : > { %s149_s4 = scalar_lea.vmem (!%p538_p8), [#allocation2], %s283_s30 }
  0x2a   : > { %452 = dma.done.wait (%p525_p4), %s146_s3, 128  }
  0x2b   : > { %454 = vsyncadd (%p525_p4), %s146_s3, 4294967168 }
  0x2c   : > { %456 = dma.done.wait (%p40_p1), [#allocation6], 128  }
  0x2d   : > { %458 = vsyncadd (%p40_p1), [#allocation6], 4294967168  ;;  %s287_s20 = sshll.u32 %s516_s13, 3  ;;  %s175_s8 = scalar_lea.vmem [#allocation7], %s283_s30  ;;  %v176_v0 = vld [vmem:[%s149_s4] sm:$0xff]  ;;  %v177_v1 = vld [vmem:[#allocation5] sm:$0xff] }
  0x2e   : > { %s191_s7 = scalar_lea.hbm %s635_s2, %s287_s20  ;;  %s193_s14 = sshll.u32 %s175_s8, 4  ;;  %v178_v2 = vadd.f32 %v177_v1, %v176_v0  ;;  %s194_s14 = int_to_ptr.vmem [resolvable:$true] %s193_s14 }
  0x2f   : > { %s195_s17 = sshll.u32 %s191_s7, 4  ;;  %s181_s15 = scalar_lea.sflag [#allocation4], %s588_s28  ;;  %s196_s17 = int_to_ptr.hbm [resolvable:$true] %s195_s17 }
  0x30   : > { %179 = vst [vmem:[%s175_s8] sm:$0xff] %v178_v2  ;;  %s421_s18 = sshra.s32 %s196_s17, 4  ;;  %s427_s22 = scalar_lea.hbm %s635_s2, 16  ;;  %s422_s18 = int_to_ptr.hbm [resolvable:$true] %s421_s18 }
  0x31   : > { %s423_s19 = scalar_lea.hbm %s422_s18, 8  ;;  %p428_p9 = scmp.lt.s32.totalorder %s422_s18, %s635_s2 }
  0x32   : > { %p424_p1 = scmp.ne.s32.totalorder %s422_s18, %s423_s19  ;;  %p429_p10 = scmp.lt.s32.totalorder %s427_s22, %s423_s19 }
  0x34   : > { %p425_p4 = pnand %p424_p1, %p561_p3  ;;  %p430_p2 = por %p429_p10, %p428_p9 }
  0x36   : > { %p426_p8 = pneg %p425_p4 }
  0x38   : > { %p431_p11 = pnand %p430_p2, %p426_p8 }
  0x3a   : > { %434 = shalt.err (!%p431_p11)
}
  0x3b   : > { %296 = dma.vmem_to_hbm [thread:$0]  (%p561_p3), %s194_s14, 128, %s196_s17, %s181_s15  }
  0x3c PF: > { %s207_s29 = sand.u32 1, %s465_s9   ;;  %p641_p12 = scmp.ge.s32.totalorder %s477_s12, 2 }
  0x3d   : > { %s208_s28 = scalar_lea.sflag [#allocation4], %s207_s29 }
  0x3e   : > { %p307_p13 = pnand %p641_p12, %p530_p6 }
  0x40   : > { %p308_p0 = pneg %p307_p13 }
  0x42   : > { %460 = dma.done.wait (%p308_p0), %s208_s28, 128  }
  0x43   : > { %462 = vsyncadd (%p308_p0), %s208_s28, 4294967168  ;;  %p16_p5 = scmp.ge.s32.totalorder %s548_s23, 4   ;;  %s642_s9 = smov %s469_s10 }
  0x44   : > { %s643_s10 = smov %s473_s11  ;;  %s644_s11 = smov %s557_s26 }
  0x45   : > { %s645_s12 = smov %s548_s23  ;;  %18 = sbr.rel (!%p16_p5) target bundleno = 6 (0x6), region = 77 }
  0x4a   :  { %214 = vsyncpa [#allocation3], 1 }
  0x4b   :  { %216 = vsyncpa [#allocation3 + $0x1], 1 }
  0x4c   :  { %217 = vsyncpa [#allocation6], 1 }
  0x4d   :  { %218 = vsyncpa [#allocation4], 1 }
  0x4e   :  { %220 = vsyncpa [#allocation4 + $0x1], 1 }

// kernel: _forward.1
= control target key start
LH: loop header
LB: loop body
LE: loop exit
PB: predicated region body
PF: predicated region fallthrough
CT: control target
= control target key end

     0   :  { %14 = vsyncpa [#allocation3], 0  ;;  %s488_s0 = inlined_call_operand.vmem [shape: f32[16,128], index: 0, kind: input, shape index: {}]   ;;  %s489_s1 = inlined_call_operand.hbm [shape: f32[128,128], index: 1, kind: input, shape index: {}]   ;;  %s490_s2 = inlined_call_operand.hbm [shape: f32[128,128], index: 2, kind: input, shape index: {}]   ;;  %s491_s3 = inlined_call_operand.hbm [shape: f32[128,128], index: 3, kind: input, shape index: {}]   ;;  %s492_s4 = inlined_call_operand.hbm [shape: f32[128,128], index: 4, kind: input, shape index: {}]   ;;  %s493_s5 = inlined_call_operand.vmem [shape: f32[1,128], index: 5, kind: input, shape index: {}]   ;;  %s494_s6 = inlined_call_operand.vmem [shape: f32[1,128], index: 6, kind: input, shape index: {}]   ;;  %s495_s7 = inlined_call_operand.vmem [shape: f32[1,128], index: 7, kind: input, shape index: {}]   ;;  %s496_s8 = inlined_call_operand.vmem [shape: f32[1,128], index: 8, kind: input, shape index: {}]   ;;  %s497_s9 = inlined_call_operand.vmem [shape: f32[16,128], index: 9, kind: output, shape index: {}]  }
   0x1   :  { %15 = vsyncpa [#allocation5], 0 }
   0x2   :  { %16 = vsyncpa [#allocation8], 0  ;;  %s36_s11 = sshll.u32 %s490_s2, 4  ;;  %s396_s12 = smov [#allocation4]   ;;  %s37_s11 = int_to_ptr.hbm [resolvable:$true] %s36_s11 }
   0x3   :  { %s38_s13 = sshll.u32 %s396_s12, 4  ;;  %s23_s16 = sshll.u32 %s489_s1, 4  ;;  %s39_s13 = int_to_ptr.vmem [resolvable:$true] %s38_s13  ;;  %s24_s16 = int_to_ptr.hbm [resolvable:$true] %s23_s16 }
   0x4   :  { %s397_s17 = smov 128   ;;  %s398_s18 = smov 8  }
   0x5   :  { %44 = dma.hbm_to_vmem [thread:$0]  %s37_s11, 2048, %s39_s13, [#allocation5], %s397_s17, %s397_s17, %s398_s18  }
   0x6   :  { %s399_s19 = smov [#allocation2]   ;;  %s49_s23 = sshll.u32 %s491_s3, 4  ;;  %s50_s23 = int_to_ptr.hbm [resolvable:$true] %s49_s23 }
   0x7   :  { %s25_s20 = sshll.u32 %s399_s19, 4  ;;  %s62_s25 = sshll.u32 %s492_s4, 4  ;;  %s26_s20 = int_to_ptr.vmem [resolvable:$true] %s25_s20  ;;  %s63_s25 = int_to_ptr.hbm [resolvable:$true] %s62_s25 }
   0x8   :  { %31 = dma.hbm_to_vmem [thread:$0]  %s24_s16, 2048, %s26_s20, [#allocation3], %s397_s17, %s397_s17, %s398_s18  }
   0x9   :  { %s400_s26 = smov [#allocation6]   ;;  %s401_s1 = smov [#allocation7]  }
   0xa   :  { %s51_s27 = sshll.u32 %s400_s26, 4  ;;  %s64_s28 = sshll.u32 %s401_s1, 4  ;;  %s52_s27 = int_to_ptr.vmem [resolvable:$true] %s51_s27  ;;  %s65_s28 = int_to_ptr.vmem [resolvable:$true] %s64_s28 }
   0xb   :  { %57 = dma.hbm_to_vmem [thread:$0]  %s50_s23, 2048, %s52_s27, [#allocation5], %s397_s17, %s397_s17, %s398_s18  }
   0xc   :  { %70 = dma.hbm_to_vmem [thread:$0]  %s63_s25, 2048, %s65_s28, [#allocation8], %s397_s17, %s397_s17, %s398_s18  }
   0xd   :  { %390 = dma.done.wait [#allocation3], 2048  }
   0xe   :  { %391 = vsyncadd [#allocation3], 4294965248 }
   0xf   :  { %392 = dma.done.wait [#allocation5], 4096  }
  0x10   :  { %393 = vsyncadd [#allocation5], 4294963200 }
  0x11   :  { %394 = dma.done.wait [#allocation8], 2048  }
  0x12   :  { %395 = vsyncadd [#allocation8], 4294965248  ;;  %v112_v0 = vld [vmem:[#allocation2 + $0x78] sm:$0xff]  ;;  %v111_v1 = vld [vmem:[#allocation2 + $0x70] sm:$0xff] }
  0x13   :  { %117 = vmatpush.msra.mxu0 %v112_v0  ;;  %v110_v2 = vld [vmem:[#allocation2 + $0x68] sm:$0xff]  ;;  %v109_v3 = vld [vmem:[#allocation2 + $0x60] sm:$0xff]  ;;  %v108_v4 = vld [vmem:[#allocation2 + $0x58] sm:$0xff] }
  0x14   :  { %v107_v5 = vld [vmem:[#allocation2 + $0x50] sm:$0xff]  ;;  %v157_v6 = vld [vmem:[#allocation4 + $0x78] sm:$0xff]  ;;  %v106_v8 = vld [vmem:[#allocation2 + $0x48] sm:$0xff] }
  0x15   :  { %118 = vmatpush.msra.mxu0 %v111_v1  ;;  %v156_v7 = vld [vmem:[#allocation4 + $0x70] sm:$0xff]  ;;  %162 = vmatpush.msra.mxu1 %v157_v6  ;;  %v155_v9 = vld [vmem:[#allocation4 + $0x68] sm:$0xff]  ;;  %v105_v10 = vld [vmem:[#allocation2 + $0x40] sm:$0xff] }
  0x16   :  { %v154_v11 = vld [vmem:[#allocation4 + $0x60] sm:$0xff]  ;;  %v104_v12 = vld [vmem:[#allocation2 + $0x38] sm:$0xff]  ;;  %v103_v14 = vld [vmem:[#allocation2 + $0x30] sm:$0xff] }
  0x17   :  { %119 = vmatpush.msra.mxu0 %v110_v2  ;;  %163 = vmatpush.msra.mxu1 %v156_v7  ;;  %v153_v13 = vld [vmem:[#allocation4 + $0x58] sm:$0xff]  ;;  %v152_v15 = vld [vmem:[#allocation4 + $0x50] sm:$0xff]  ;;  %v102_v16 = vld [vmem:[#allocation2 + $0x28] sm:$0xff] }
  0x18   :  { %v151_v17 = vld [vmem:[#allocation4 + $0x48] sm:$0xff]  ;;  %v101_v18 = vld [vmem:[#allocation2 + $0x20] sm:$0xff]  ;;  %v100_v20 = vld [vmem:[#allocation2 + $0x18] sm:$0xff] }
  0x19   :  { %120 = vmatpush.msra.mxu0 %v109_v3  ;;  %164 = vmatpush.msra.mxu1 %v155_v9  ;;  %v150_v19 = vld [vmem:[#allocation4 + $0x40] sm:$0xff]  ;;  %v149_v21 = vld [vmem:[#allocation4 + $0x38] sm:$0xff]  ;;  %v99_v22 = vld [vmem:[#allocation2 + $0x10] sm:$0xff] }
  0x1a   :  { %v148_v23 = vld [vmem:[#allocation4 + $0x30] sm:$0xff]  ;;  %v98_v24 = vld [vmem:[#allocation2 + $0x8] sm:$0xff]  ;;  %v97_v26 = vld [vmem:[#allocation2] sm:$0xff] }
  0x1b   :  { %121 = vmatpush.msra.mxu0 %v108_v4  ;;  %165 = vmatpush.msra.mxu1 %v154_v11  ;;  %v147_v25 = vld [vmem:[#allocation4 + $0x28] sm:$0xff]  ;;  %v146_v27 = vld [vmem:[#allocation4 + $0x20] sm:$0xff]  ;;  %v145_v29 = vld [vmem:[#allocation4 + $0x18] sm:$0xff] }
  0x1c   :  { %v95_v28 = vld [vmem:[%s488_s0] sm:$0xff]  ;;  %v96_v30 = vld [vmem:[%s488_s0 + $0x8] sm:$0xff]  ;;  %v144_v31 = vld [vmem:[#allocation4 + $0x10] sm:$0xff] }
  0x1d   :  { %122 = vmatpush.msra.mxu0 %v107_v5  ;;  %166 = vmatpush.msra.mxu1 %v153_v13  ;;  %v143_v32 = vld [vmem:[#allocation4 + $0x8] sm:$0xff]  ;;  %v142_v33 = vld [vmem:[#allocation4] sm:$0xff]  ;;  %v202_v34 = vld [vmem:[#allocation6 + $0x78] sm:$0xff] }
  0x1e   :  { %v201_v35 = vld [vmem:[#allocation6 + $0x70] sm:$0xff]  ;;  %207 = vmatpush.msra.mxu2 %v202_v34  ;;  %v200_v36 = vld [vmem:[#allocation6 + $0x68] sm:$0xff]  ;;  %v199_v37 = vld [vmem:[#allocation6 + $0x60] sm:$0xff] }
  0x1f   :  { %123 = vmatpush.msra.mxu0 %v106_v8  ;;  %167 = vmatpush.msra.mxu1 %v152_v15  ;;  %v198_v38 = vld [vmem:[#allocation6 + $0x58] sm:$0xff]  ;;  %v197_v39 = vld [vmem:[#allocation6 + $0x50] sm:$0xff]  ;;  %v196_v40 = vld [vmem:[#allocation6 + $0x48] sm:$0xff] }
  0x20   :  { %208 = vmatpush.msra.mxu2 %v201_v35  ;;  %v195_v41 = vld [vmem:[#allocation6 + $0x40] sm:$0xff]  ;;  %v194_v42 = vld [vmem:[#allocation6 + $0x38] sm:$0xff]  ;;  %v193_v44 = vld [vmem:[#allocation6 + $0x30] sm:$0xff] }
  0x21   :  { %124 = vmatpush.msra.mxu0 %v105_v10  ;;  %168 = vmatpush.msra.mxu1 %v151_v17  ;;  %v290_v43 = vld [vmem:[%s493_s5] ss:$0 sm:$0xff]  ;;  %v192_v45 = vld [vmem:[#allocation6 + $0x28] sm:$0xff]  ;;  %v190_v50 = vld [vmem:[#allocation6 + $0x18] sm:$0xff] }
  0x22   :  { %209 = vmatpush.msra.mxu2 %v200_v36  ;;  %v191_v48 = vld [vmem:[#allocation6 + $0x20] sm:$0xff]  ;;  %v189_v54 = vld [vmem:[#allocation6 + $0x10] sm:$0xff]  ;;  %v188_v55 = vld [vmem:[#allocation6 + $0x8] sm:$0xff] }
  0x23   :  { %125 = vmatpush.msra.mxu0 %v104_v12  ;;  %169 = vmatpush.msra.mxu1 %v150_v19  ;;  %v187_v56 = vld [vmem:[#allocation6] sm:$0xff]  ;;  %v247_v57 = vld [vmem:[#allocation7 + $0x78] sm:$0xff]  ;;  %v246_v58 = vld [vmem:[#allocation7 + $0x70] sm:$0xff] }
  0x24   :  { %210 = vmatpush.msra.mxu2 %v199_v37  ;;  %252 = vmatpush.msra.mxu3 %v247_v57  ;;  %v245_v59 = vld [vmem:[#allocation7 + $0x68] sm:$0xff]  ;;  %v244_v60 = vld [vmem:[#allocation7 + $0x60] sm:$0xff]  ;;  %v243_v61 = vld [vmem:[#allocation7 + $0x58] sm:$0xff] }
  0x25   :  { %126 = vmatpush.msra.mxu0 %v103_v14  ;;  %170 = vmatpush.msra.mxu1 %v149_v21  ;;  %v242_v62 = vld [vmem:[#allocation7 + $0x50] sm:$0xff]  ;;  %v241_v63 = vld [vmem:[#allocation7 + $0x48] sm:$0xff]  ;;  %v240_v0 = vld [vmem:[#allocation7 + $0x40] sm:$0xff] }
  0x26   :  { %211 = vmatpush.msra.mxu2 %v198_v38  ;;  %253 = vmatpush.msra.mxu3 %v246_v58  ;;  %v239_v1 = vld [vmem:[#allocation7 + $0x38] sm:$0xff]  ;;  %v291_v2 = vld [vmem:[%s494_s6] ss:$0 sm:$0xff]  ;;  %v238_v3 = vld [vmem:[#allocation7 + $0x30] sm:$0xff] }
  0x27   :  { %127 = vmatpush.msra.mxu0 %v102_v16  ;;  %171 = vmatpush.msra.mxu1 %v148_v23  ;;  %v237_v4 = vld [vmem:[#allocation7 + $0x28] sm:$0xff]  ;;  %v236_v7 = vld [vmem:[#allocation7 + $0x20] sm:$0xff]  ;;  %v235_v9 = vld [vmem:[#allocation7 + $0x18] sm:$0xff] }
  0x28   :  { %212 = vmatpush.msra.mxu2 %v197_v39  ;;  %254 = vmatpush.msra.mxu3 %v245_v59  ;;  %v234_v13 = vld [vmem:[#allocation7 + $0x10] sm:$0xff]  ;;  %v233_v14 = vld [vmem:[#allocation7 + $0x8] sm:$0xff]  ;;  %v232_v15 = vld [vmem:[#allocation7] sm:$0xff] }
  0x29   :  { %128 = vmatpush.msra.mxu0 %v101_v18  ;;  %172 = vmatpush.msra.mxu1 %v147_v25  ;;  %v292_v16 = vld [vmem:[%s495_s7] ss:$0 sm:$0xff] }
  0x2a   :  { %213 = vmatpush.msra.mxu2 %v196_v40  ;;  %255 = vmatpush.msra.mxu3 %v244_v60  ;;  %v293_v23 = vld [vmem:[%s496_s8] ss:$0 sm:$0xff] }
  0x2b   :  { %129 = vmatpush.msra.mxu0 %v100_v20  ;;  %173 = vmatpush.msra.mxu1 %v146_v27 }
  0x2c   :  { %214 = vmatpush.msra.mxu2 %v195_v41  ;;  %256 = vmatpush.msra.mxu3 %v243_v61 }
  0x2d   :  { %130 = vmatpush.msra.mxu0 %v99_v22  ;;  %174 = vmatpush.msra.mxu1 %v145_v29 }
  0x2e   :  { %215 = vmatpush.msra.mxu2 %v194_v42  ;;  %257 = vmatpush.msra.mxu3 %v242_v62 }
  0x2f   :  { %131 = vmatpush.msra.mxu0 %v98_v24  ;;  %175 = vmatpush.msra.mxu1 %v144_v31 }
  0x30   :  { %216 = vmatpush.msra.mxu2 %v193_v44  ;;  %258 = vmatpush.msra.mxu3 %v241_v63 }
  0x31   :  { %132 = vmatpush.msra.mxu0 %v97_v26  ;;  %176 = vmatpush.msra.mxu1 %v143_v32 }
  0x32   :  { %133 = vmatmul.f32.vlgmr.msra.gmra.mxu0 %v95_v28  ;;  %217 = vmatpush.msra.mxu2 %v192_v45 }
  0x33   :  { %177 = vmatpush.msra.mxu1 %v142_v33  ;;  %259 = vmatpush.msra.mxu3 %v240_v0 }
  0x34   :  { %218 = vmatpush.msra.mxu2 %v191_v48 }
  0x35   :  { %260 = vmatpush.msra.mxu3 %v239_v1 }
  0x36   :  { %219 = vmatpush.msra.mxu2 %v190_v50 }
  0x37   :  { %261 = vmatpush.msra.mxu3 %v238_v3 }
  0x38   :  { %220 = vmatpush.msra.mxu2 %v189_v54 }
  0x39   :  { %262 = vmatpush.msra.mxu3 %v237_v4 }
  0x3a   :  { %136 = vmatmul.f32.gmra.mxu0 %v96_v30  ;;  %221 = vmatpush.msra.mxu2 %v188_v55 }
  0x3b   :  { %263 = vmatpush.msra.mxu3 %v236_v7 }
  0x3c   :  { %222 = vmatpush.msra.mxu2 %v187_v56 }
  0x3d   :  { %264 = vmatpush.msra.mxu3 %v235_v9 }
  0x3f   :  { %265 = vmatpush.msra.mxu3 %v234_v13 }
  0x41   :  { %266 = vmatpush.msra.mxu3 %v233_v14 }
  0x43   :  { %267 = vmatpush.msra.mxu3 %v232_v15 }
  0xaf   :  { %v134_v46 = vpop.f32.mrf.mxu0 }
  0xb0   :  { %v135_v47 = vadd.f32 %v290_v43, %v134_v46 }
  0xb2   :  { %v140_v49 = vmax.f32 %v135_v47, 0.0 }
  0xb4   :  { %178 = vmatmul.f32.vlgmr.msra.gmra.mxu1 %v140_v49 }
  0xb7   :  { %v137_v51 = vpop.f32.mrf.mxu0 }
  0xb8   :  { %v138_v52 = vadd.f32 %v290_v43, %v137_v51 }
  0xba   :  { %v141_v53 = vmax.f32 %v138_v52, 0.0 }
  0xbc   :  { %181 = vmatmul.f32.gmra.mxu1 %v141_v53 }
 0x131   :  { %v179_v5 = vpop.f32.mrf.mxu1 }
 0x132   :  { %v180_v6 = vadd.f32 %v291_v2, %v179_v5 }
 0x134   :  { %v185_v8 = vmax.f32 %v180_v6, 0.0 }
 0x136   :  { %223 = vmatmul.f32.vlgmr.msra.gmra.mxu2 %v185_v8 }
 0x139   :  { %v182_v10 = vpop.f32.mrf.mxu1 }
 0x13a   :  { %v183_v11 = vadd.f32 %v291_v2, %v182_v10 }
 0x13c   :  { %v186_v12 = vmax.f32 %v183_v11, 0.0 }
 0x13e   :  { %226 = vmatmul.f32.gmra.mxu2 %v186_v12 }
 0x1b9   :  { %v224_v17 = vpop.f32.mrf.mxu2 }
 0x1ba   :  { %v225_v18 = vadd.f32 %v292_v16, %v224_v17 }
 0x1bc   :  { %v230_v19 = vmax.f32 %v225_v18, 0.0 }
 0x1be   :  { %268 = vmatmul.f32.vlgmr.msra.gmra.mxu3 %v230_v19 }
 0x1c1   :  { %v227_v20 = vpop.f32.mrf.mxu2 }
 0x1c2   :  { %v228_v21 = vadd.f32 %v292_v16, %v227_v20 }
 0x1c4   :  { %v231_v22 = vmax.f32 %v228_v21, 0.0 }
 0x1c6   :  { %271 = vmatmul.f32.gmra.mxu3 %v231_v22 }
 0x241   :  { %v269_v24 = vpop.f32.mrf.mxu3 }
 0x242   :  { %v270_v25 = vadd.f32 %v293_v23, %v269_v24 }
 0x244   :  { %275 = vst [vmem:[%s497_s9] sm:$0xff] %v270_v25 }
 0x249   :  { %v272_v26 = vpop.f32.mrf.mxu3 }
 0x24a   :  { %v273_v27 = vadd.f32 %v293_v23, %v272_v26 }
 0x24c   :  { %276 = vst [vmem:[%s497_s9 + $0x8] sm:$0xff] %v273_v27 }
 0x24d   :  { %281 = vsyncpa [#allocation3], 1 }
 0x24e   :  { %282 = vsyncpa [#allocation5], 1 }
 0x24f   :  { %283 = vsyncpa [#allocation8], 1 }

</bundles_post_ra>
